<compile_context>
chip_gen: v5e
topology: v5e:2x2
jax: 0.10.0
libtpu: 0.0.40
codegen_flags: <defaults>
</compile_context>

<pallas_src>
import functools
import math

import jax
import jax.numpy as jnp
from jax import lax
from jax.experimental import pallas as pl
from jax.experimental.pallas import tpu as pltpu


def _gated_mtrnn_rollout_kernel(
    open_rate, pos_dims, io_dim, out_dim,
    # ---- inputs ----
    x_ref,          # (B, IN)        current timestep input (leading T squeezed)
    last0_ref,      # (B, OUT)       last_output carried in from previous call
    state0_ref,     # (2, B, H)      [u | y] carried in from previous call
    aw1, ab1, aw2, ab2, aw3, ab3,          # attention MLP (aw3/ab3 zero-padded to IN)
    w_in, w_rec, b_rec, inv_tau,           # fused recurrent weights / per-lane 1/tau
    w_out, b_out,                          # output head
    # ---- outputs ----
    slab_ref,       # (B, OUT+IN)    [output | full-width gate]  (per step)
    state_ref,      # (2, B, H)      [u | y]   resident across grid, final state
    # ---- scratch ----
    last_scr,       # (B, OUT)       previous-step output carry
):
    t = pl.program_id(0)

    @pl.when(t == 0)
    def _():
        state_ref[...] = state0_ref[...]
        last_scr[...] = last0_ref[...]

    x = x_ref[...]
    # Open/closed-loop mixing. On the very first step ever, the host passes
    # last0 == x[0], so the blend is an exact no-op (matches "last is None").
    x = open_rate * x + (1.0 - open_rate) * last_scr[...]

    # ---- attention MLP: IN -> 100 -> 100 -> IN (first pos_dims cols padded) ----
    h = jnp.maximum(jnp.dot(x, aw1[...], preferred_element_type=jnp.float32) + ab1[...], 0.0)
    h = jnp.maximum(jnp.dot(h, aw2[...], preferred_element_type=jnp.float32) + ab2[...], 0.0)
    logits = jnp.dot(h, aw3[...], preferred_element_type=jnp.float32) + ab3[...]

    lane = lax.broadcasted_iota(jnp.int32, logits.shape, 1)
    sens_mask = lane >= pos_dims
    logits = jnp.where(sens_mask, logits, -1e30)
    m = jnp.max(logits, axis=-1, keepdims=True)
    e = jnp.where(sens_mask, jnp.exp(logits - m), 0.0)
    denom = jnp.sum(e, axis=-1, keepdims=True)
    attn = e * pl.reciprocal(denom, approx=True) * 34.0   # literal *34 from the spec
    # Full-width gate: first pos_dims lanes pass through unscaled.
    gate = jnp.where(sens_mask, attn, 1.0)
    xg = x * gate

    # ---- fused MTRNN step ----
    u = state_ref[0]
    y = state_ref[1]
    pre = (jnp.dot(xg, w_in[...], preferred_element_type=jnp.float32)
           + jnp.dot(y, w_rec[...], preferred_element_type=jnp.float32)
           + b_rec[...])
    u_new = u + inv_tau[...] * (pre - u)        # == (1 - 1/tau)*u + (1/tau)*pre
    y_new = jnp.maximum(u_new, 0.0)             # activate = torch.nn.ReLU()

    out = jnp.tanh(jnp.dot(y_new[:, :io_dim], w_out[...],
                           preferred_element_type=jnp.float32) + b_out[...])

    # ---- write carries + per-step output slab ----
    state_ref[0] = u_new
    state_ref[1] = y_new
    last_scr[...] = out
    slab_ref[:, :out_dim] = out
    slab_ref[:, out_dim:] = gate   # columns out_dim+pos_dims: == attention_map


def _linear_params(key, fan_in, fan_out):
    """Deterministic PyTorch-style init: U(-1/sqrt(fan_in), 1/sqrt(fan_in))."""
    kw, kb = jax.random.split(key)
    bound = 1.0 / math.sqrt(fan_in)
    w = jax.random.uniform(kw, (fan_in, fan_out), jnp.float32, -bound, bound)
    b = jax.random.uniform(kb, (1, fan_out), jnp.float32, -bound, bound)
    return w, b


class GatedMTRNNPallas:
    def __init__(self, layer_size, tau, open_rate=1.0, position_dims=7, seed=0):
        self.layer_size = dict(layer_size)
        self.tau = {k: float(v) for k, v in tau.items()}
        self.open_rate = float(open_rate)
        self.pos = int(position_dims)
        IN, OUT = layer_size['in'], layer_size['out']
        IO, CF, CS = layer_size['io'], layer_size['cf'], layer_size['cs']
        sens = IN - self.pos
        assert sens > 0, "layer_size['in'] must exceed position_dims"
        # The open/closed-loop mix adds last_output (B, out) to x (B, in), so the
        # original module implicitly requires in == out whenever state exists.
        assert IN == OUT, "open/closed-loop mixing requires layer_size['in'] == layer_size['out']"
        self.H = IO + CF + CS

        ks = jax.random.split(jax.random.PRNGKey(seed), 12)
        # attention MLP
        aw1, ab1 = _linear_params(ks[0], IN, 100)
        aw2, ab2 = _linear_params(ks[1], 100, 100)
        aw3, ab3 = _linear_params(ks[2], 100, sens)
        # MTRNN linears (stored (in, out))
        w_i2io, b_i2io = _linear_params(ks[3], IN, IO)
        w_io2io, b_io2io = _linear_params(ks[4], IO, IO)
        w_cf2io, b_cf2io = _linear_params(ks[5], CF, IO)
        w_io2cf, b_io2cf = _linear_params(ks[6], IO, CF)
        w_cf2cf, b_cf2cf = _linear_params(ks[7], CF, CF)
        w_cs2cf, b_cs2cf = _linear_params(ks[8], CS, CF)
        w_cf2cs, b_cf2cs = _linear_params(ks[9], CF, CS)
        w_cs2cs, b_cs2cs = _linear_params(ks[10], CS, CS)
        w_io2o, b_io2o = _linear_params(ks[11], IO, OUT)

        z = lambda r, c: jnp.zeros((r, c), jnp.float32)
        # Pad the attention head to full input width (zero weights/bias for the
        # position lanes) so gating is a single full-width multiply in-kernel.
        aw3_pad = jnp.concatenate([z(100, self.pos), aw3], axis=1)
        ab3_pad = jnp.concatenate([z(1, self.pos), ab3], axis=1)
        # Fused recurrent weights: [xg] @ w_in + [y_io|y_cf|y_cs] @ w_rec + b_rec
        w_in = jnp.concatenate([w_i2io, z(IN, CF), z(IN, CS)], axis=1)          # (IN, H)
        w_rec = jnp.concatenate([
            jnp.concatenate([w_io2io, w_io2cf, z(IO, CS)], axis=1),
            jnp.concatenate([w_cf2io, w_cf2cf, w_cf2cs], axis=1),
            jnp.concatenate([z(CS, IO), w_cs2cf, w_cs2cs], axis=1),
        ], axis=0)                                                              # (H, H)
        b_rec = jnp.concatenate([
            b_i2io + b_io2io + b_cf2io,
            b_io2cf + b_cf2cf + b_cs2cf,
            b_cf2cs + b_cs2cs,
        ], axis=1)                                                              # (1, H)
        inv_tau = jnp.concatenate([
            jnp.full((1, IO), 1.0 / self.tau['tau_io'], jnp.float32),
            jnp.full((1, CF), 1.0 / self.tau['tau_cf'], jnp.float32),
            jnp.full((1, CS), 1.0 / self.tau['tau_cs'], jnp.float32),
        ], axis=1)                                                              # (1, H)

        self._weights = (aw1, ab1, aw2, ab2, aw3_pad, ab3_pad,
                         w_in, w_rec, b_rec, inv_tau, w_io2o, b_io2o)

        self.state = None            # (2, B, H): [u | y]
        self.last_output = None
        self.attention_map = None
        self._fwd_cache = {}

    def init_state(self, batch_size):
        self.state = jnp.zeros((2, batch_size, self.H), jnp.float32)
        self.last_output = None
        self.attention_map = None

    def _get_forward(self, T, B):
        key = (T, B)
        if key in self._fwd_cache:
            return self._fwd_cache[key]

        ls = self.layer_size
        IN, OUT, H = ls['in'], ls['out'], self.H

        kernel = functools.partial(
            _gated_mtrnn_rollout_kernel,
            self.open_rate, self.pos, ls['io'], OUT)

        def full_spec(shape):
            nd = len(shape)
            # Whole array resident in VMEM; constant block index => DMA'd once.
            return pl.BlockSpec(shape, lambda t, _nd=nd: (0,) * _nd)

        in_specs = (
            [pl.BlockSpec((None, B, IN), lambda t: (t, 0, 0)),   # x_seq, per-step block
             full_spec((B, OUT)),                                # last0
             full_spec((2, B, H))]                               # state0
            + [full_spec(w.shape) for w in self._weights]
        )
        out_specs = (
            pl.BlockSpec((None, B, OUT + IN), lambda t: (t, 0, 0)),  # per-step slab
            pl.BlockSpec((2, B, H), lambda t: (0, 0, 0)),            # resident state
        )
        out_shape = (
            jax.ShapeDtypeStruct((T, B, OUT + IN), jnp.float32),
            jax.ShapeDtypeStruct((2, B, H), jnp.float32),
        )

        call = pl.pallas_call(
            kernel,
            out_shape=out_shape,
            grid=(T,),
            in_specs=in_specs,
            out_specs=out_specs,
            scratch_shapes=[pltpu.VMEM((B, OUT), jnp.float32)],   # last_output carry
            compiler_params=pltpu.CompilerParams(
                dimension_semantics=("arbitrary",)),              # sequential RNN steps
        )

        fwd = jax.jit(lambda x_seq, last0, state0, *w: call(x_seq, last0, state0, *w))
        self._fwd_cache[key] = fwd
        return fwd

    def rollout(self, x_seq):
        """Run T timesteps fused in one pallas_call. x_seq: (T, B, in)."""
        T, B, IN = x_seq.shape
        assert IN == self.layer_size['in']
        if self.state is None or self.state.shape[1] != B:
            self.init_state(B)
        # If no previous output exists, passing x_seq[0] makes the step-0 blend
        # an exact identity (matches the PyTorch "last_output is None" branch).
        last0 = self.last_output if self.last_output is not None else x_seq[0]

        slab, state = self._get_forward(T, B)(x_seq, last0, self.state, *self._weights)

        OUT, pos = self.layer_size['out'], self.pos
        out_seq = slab[:, :, :OUT]
        self.attention_map = slab[-1, :, OUT + pos:]
        self.state = state
        self.last_output = out_seq[-1]
        return out_seq

    def __call__(self, x):
        """Single step, same semantics as the PyTorch forward. x: (B, in)."""
        return self.rollout(x[None])[0]


if __name__ == "__main__":
    # in = 7 position dims + 13 sensors
    layer_size = {'in': 20, 'out': 20, 'io': 32, 'cf': 32, 'cs': 16}
    tau = {'tau_io': 2.0, 'tau_cf': 5.0, 'tau_cs': 70.0}
    batch, T = 8, 8

    model = GatedMTRNNPallas(layer_size, tau, open_rate=0.8, position_dims=7, seed=0)
    model.init_state(batch)

    x_seq = jax.random.normal(jax.random.PRNGKey(0), (T, batch, layer_size['in']), jnp.float32)

    y_seq = model.rollout(x_seq)    # T fused timesteps in one pallas_call
    y_step = model(x_seq[0])        # single PyTorch-style step (exercises carry-over)

    jax.block_until_ready((y_seq, y_step, model.state, model.attention_map))
    assert y_seq.shape == (T, batch, layer_size['out'])
    assert y_step.shape == (batch, layer_size['out'])
    assert model.attention_map.shape == (batch, layer_size['in'] - 7)
    assert bool(jnp.all(jnp.isfinite(y_seq))) and bool(jnp.all(jnp.isfinite(y_step)))
    print("KERNEL_OK")
</pallas_src>

<mosaic_0001>
module attributes {stable_mosaic.version = 11 : i64} {
  func.func @_gated_mtrnn_rollout_kernel(%arg0: i32, %arg1: memref<1x8x20xf32, #tpu.memory_space<vmem>>, %arg2: memref<8x20xf32, #tpu.memory_space<vmem>>, %arg3: memref<2x8x80xf32, #tpu.memory_space<vmem>>, %arg4: memref<20x100xf32, #tpu.memory_space<vmem>>, %arg5: memref<1x100xf32, #tpu.memory_space<vmem>>, %arg6: memref<100x100xf32, #tpu.memory_space<vmem>>, %arg7: memref<1x100xf32, #tpu.memory_space<vmem>>, %arg8: memref<100x20xf32, #tpu.memory_space<vmem>>, %arg9: memref<1x20xf32, #tpu.memory_space<vmem>>, %arg10: memref<20x80xf32, #tpu.memory_space<vmem>>, %arg11: memref<80x80xf32, #tpu.memory_space<vmem>>, %arg12: memref<1x80xf32, #tpu.memory_space<vmem>>, %arg13: memref<1x80xf32, #tpu.memory_space<vmem>>, %arg14: memref<32x20xf32, #tpu.memory_space<vmem>>, %arg15: memref<1x20xf32, #tpu.memory_space<vmem>>, %arg16: memref<1x8x40xf32, #tpu.memory_space<vmem>>, %arg17: memref<2x8x80xf32, #tpu.memory_space<vmem>>, %arg18: memref<8x20xf32, #tpu.memory_space<vmem>>) attributes {dimension_semantics = [#tpu.dimension_semantics<arbitrary>], iteration_bounds = array<i64: 8>, scalar_prefetch = 0 : i64, scratch_operands = 1 : i64, tpu.core_type = #tpu.core_type<tc>, window_params = [{transform_indices = @transform_0, window_bounds = array<i64: 1, 8, 20>}, {pipeline_mode = #tpu.pipeline_mode<synchronous>, transform_indices = @transform_1, window_bounds = array<i64: 8, 20>}, {pipeline_mode = #tpu.pipeline_mode<synchronous>, transform_indices = @transform_2, window_bounds = array<i64: 2, 8, 80>}, {pipeline_mode = #tpu.pipeline_mode<synchronous>, transform_indices = @transform_3, window_bounds = array<i64: 20, 100>}, {pipeline_mode = #tpu.pipeline_mode<synchronous>, transform_indices = @transform_4, window_bounds = array<i64: 1, 100>}, {pipeline_mode = #tpu.pipeline_mode<synchronous>, transform_indices = @transform_5, window_bounds = array<i64: 100, 100>}, {pipeline_mode = #tpu.pipeline_mode<synchronous>, transform_indices = @transform_6, window_bounds = array<i64: 1, 100>}, {pipeline_mode = #tpu.pipeline_mode<synchronous>, transform_indices = @transform_7, window_bounds = array<i64: 100, 20>}, {pipeline_mode = #tpu.pipeline_mode<synchronous>, transform_indices = @transform_8, window_bounds = array<i64: 1, 20>}, {pipeline_mode = #tpu.pipeline_mode<synchronous>, transform_indices = @transform_9, window_bounds = array<i64: 20, 80>}, {pipeline_mode = #tpu.pipeline_mode<synchronous>, transform_indices = @transform_10, window_bounds = array<i64: 80, 80>}, {pipeline_mode = #tpu.pipeline_mode<synchronous>, transform_indices = @transform_11, window_bounds = array<i64: 1, 80>}, {pipeline_mode = #tpu.pipeline_mode<synchronous>, transform_indices = @transform_12, window_bounds = array<i64: 1, 80>}, {pipeline_mode = #tpu.pipeline_mode<synchronous>, transform_indices = @transform_13, window_bounds = array<i64: 32, 20>}, {pipeline_mode = #tpu.pipeline_mode<synchronous>, transform_indices = @transform_14, window_bounds = array<i64: 1, 20>}, {transform_indices = @transform_15, window_bounds = array<i64: 1, 8, 40>}, {pipeline_mode = #tpu.pipeline_mode<synchronous>, transform_indices = @transform_16, window_bounds = array<i64: 2, 8, 80>}]} {
    %c0_i32 = arith.constant 0 : i32
    %0 = arith.cmpi eq, %arg0, %c0_i32 : i32
    %1 = arith.extui %0 : i1 to i32
    %c0_i32_0 = arith.constant 0 : i32
    %2 = arith.cmpi ne, %1, %c0_i32_0 : i32
    scf.if %2 {
      %c0_63 = arith.constant 0 : index
      %c0_64 = arith.constant 0 : index
      %c0_65 = arith.constant 0 : index
      %91 = vector.load %arg3[%c0_63, %c0_64, %c0_65] : memref<2x8x80xf32, #tpu.memory_space<vmem>>, vector<2x8x80xf32>
      %c0_66 = arith.constant 0 : index
      %c0_67 = arith.constant 0 : index
      %c0_68 = arith.constant 0 : index
      %92 = vector.load %arg17[%c0_66, %c0_67, %c0_68] : memref<2x8x80xf32, #tpu.memory_space<vmem>>, vector<2x8x80xf32>
      tpu.vector_store %arg17[%c0_66, %c0_67, %c0_68], %91 {strides = array<i32>} : memref<2x8x80xf32, #tpu.memory_space<vmem>>, vector<2x8x80xf32>,
      %c0_69 = arith.constant 0 : index
      %c0_70 = arith.constant 0 : index
      %93 = vector.load %arg2[%c0_69, %c0_70] : memref<8x20xf32, #tpu.memory_space<vmem>>, vector<8x20xf32>
      %c0_71 = arith.constant 0 : index
      %c0_72 = arith.constant 0 : index
      %94 = vector.load %arg18[%c0_71, %c0_72] : memref<8x20xf32, #tpu.memory_space<vmem>>, vector<8x20xf32>
      tpu.vector_store %arg18[%c0_71, %c0_72], %93 {strides = array<i32>} : memref<8x20xf32, #tpu.memory_space<vmem>>, vector<8x20xf32>,
    } else {
    }
    %c0 = arith.constant 0 : index
    %c0_1 = arith.constant 0 : index
    %c0_2 = arith.constant 0 : index
    %3 = vector.load %arg1[%c0, %c0_1, %c0_2] : memref<1x8x20xf32, #tpu.memory_space<vmem>>, vector<1x8x20xf32>
    %4 = vector.shape_cast %3 : vector<1x8x20xf32> to vector<8x20xf32>
    %cst = arith.constant 8.000000e-01 : f32
    %5 = vector.broadcast %cst : f32 to vector<8x20xf32>
    %6 = arith.mulf %5, %4 : vector<8x20xf32>
    %c0_3 = arith.constant 0 : index
    %c0_4 = arith.constant 0 : index
    %7 = vector.load %arg18[%c0_3, %c0_4] : memref<8x20xf32, #tpu.memory_space<vmem>>, vector<8x20xf32>
    %cst_5 = arith.constant 2.000000e-01 : f32
    %8 = vector.broadcast %cst_5 : f32 to vector<8x20xf32>
    %9 = arith.mulf %8, %7 : vector<8x20xf32>
    %10 = arith.addf %6, %9 : vector<8x20xf32>
    %c0_6 = arith.constant 0 : index
    %c0_7 = arith.constant 0 : index
    %11 = vector.load %arg4[%c0_6, %c0_7] : memref<20x100xf32, #tpu.memory_space<vmem>>, vector<20x100xf32>
    %cst_8 = arith.constant dense<0.000000e+00> : vector<8x100xf32>
    %12 = tpu.matmul %10, %11, %cst_8 {dimension_numbers = #tpu.dot_dimension_numbers<[1], [0], [0], [1], [0, 0, 1, 1], [], []>} : vector<8x20xf32>, vector<20x100xf32>, vector<8x100xf32> -> vector<8x100xf32>
    %c0_9 = arith.constant 0 : index
    %c0_10 = arith.constant 0 : index
    %13 = vector.load %arg5[%c0_9, %c0_10] : memref<1x100xf32, #tpu.memory_space<vmem>>, vector<1x100xf32>
    %14 = vector.broadcast %13 : vector<1x100xf32> to vector<8x100xf32>
    %15 = arith.addf %12, %14 : vector<8x100xf32>
    %cst_11 = arith.constant 0.000000e+00 : f32
    %16 = vector.broadcast %cst_11 : f32 to vector<8x100xf32>
    %17 = arith.maximumf %15, %16 : vector<8x100xf32>
    %c0_12 = arith.constant 0 : index
    %c0_13 = arith.constant 0 : index
    %18 = vector.load %arg6[%c0_12, %c0_13] : memref<100x100xf32, #tpu.memory_space<vmem>>, vector<100x100xf32>
    %cst_14 = arith.constant dense<0.000000e+00> : vector<8x100xf32>
    %19 = tpu.matmul %17, %18, %cst_14 {dimension_numbers = #tpu.dot_dimension_numbers<[1], [0], [0], [1], [0, 0, 1, 1], [], []>} : vector<8x100xf32>, vector<100x100xf32>, vector<8x100xf32> -> vector<8x100xf32>
    %c0_15 = arith.constant 0 : index
    %c0_16 = arith.constant 0 : index
    %20 = vector.load %arg7[%c0_15, %c0_16] : memref<1x100xf32, #tpu.memory_space<vmem>>, vector<1x100xf32>
    %21 = vector.broadcast %20 : vector<1x100xf32> to vector<8x100xf32>
    %22 = arith.addf %19, %21 : vector<8x100xf32>
    %cst_17 = arith.constant 0.000000e+00 : f32
    %23 = vector.broadcast %cst_17 : f32 to vector<8x100xf32>
    %24 = arith.maximumf %22, %23 : vector<8x100xf32>
    %c0_18 = arith.constant 0 : index
    %c0_19 = arith.constant 0 : index
    %25 = vector.load %arg8[%c0_18, %c0_19] : memref<100x20xf32, #tpu.memory_space<vmem>>, vector<100x20xf32>
    %cst_20 = arith.constant dense<0.000000e+00> : vector<8x20xf32>
    %26 = tpu.matmul %24, %25, %cst_20 {dimension_numbers = #tpu.dot_dimension_numbers<[1], [0], [0], [1], [0, 0, 1, 1], [], []>} : vector<8x100xf32>, vector<100x20xf32>, vector<8x20xf32> -> vector<8x20xf32>
    %c0_21 = arith.constant 0 : index
    %c0_22 = arith.constant 0 : index
    %27 = vector.load %arg9[%c0_21, %c0_22] : memref<1x20xf32, #tpu.memory_space<vmem>>, vector<1x20xf32>
    %28 = vector.broadcast %27 : vector<1x20xf32> to vector<8x20xf32>
    %29 = arith.addf %26, %28 : vector<8x20xf32>
    %30 = tpu.iota {dimensions = array<i32: 1>} : vector<8x20xi32>
    %c7_i32 = arith.constant 7 : i32
    %31 = vector.broadcast %c7_i32 : i32 to vector<8x20xi32>
    %32 = arith.cmpi sge, %30, %31 : vector<8x20xi32>
    %cst_23 = arith.constant -1.000000e+30 : f32
    %33 = vector.broadcast %cst_23 : f32 to vector<8x20xf32>
    %34 = arith.select %32, %29, %33 : vector<8x20xi1>, vector<8x20xf32>
    %cst_24 = arith.constant dense<0xFF800000> : vector<8xf32>
    %35 = vector.multi_reduction <maximumf>, %34, %cst_24 [1] : vector<8x20xf32> to vector<8xf32>
    %36 = vector.shape_cast %35 : vector<8xf32> to vector<8x1xf32>
    %37 = vector.broadcast %36 : vector<8x1xf32> to vector<8x20xf32>
    %38 = arith.subf %34, %37 : vector<8x20xf32>
    %39 = math.exp %38 : vector<8x20xf32>
    %cst_25 = arith.constant 0.000000e+00 : f32
    %40 = vector.broadcast %cst_25 : f32 to vector<8x20xf32>
    %41 = arith.select %32, %39, %40 : vector<8x20xi1>, vector<8x20xf32>
    %cst_26 = arith.constant dense<0.000000e+00> : vector<8xf32>
    %42 = vector.multi_reduction <add>, %41, %cst_26 [1] : vector<8x20xf32> to vector<8xf32>
    %43 = vector.shape_cast %42 : vector<8xf32> to vector<8x1xf32>
    %44 = tpu.reciprocal %43 {approx = true} : vector<8x1xf32> -> vector<8x1xf32>
    %45 = vector.broadcast %44 : vector<8x1xf32> to vector<8x20xf32>
    %46 = arith.mulf %41, %45 : vector<8x20xf32>
    %cst_27 = arith.constant 3.400000e+01 : f32
    %47 = vector.broadcast %cst_27 : f32 to vector<8x20xf32>
    %48 = arith.mulf %46, %47 : vector<8x20xf32>
    %cst_28 = arith.constant 1.000000e+00 : f32
    %49 = vector.broadcast %cst_28 : f32 to vector<8x20xf32>
    %50 = arith.select %32, %48, %49 : vector<8x20xi1>, vector<8x20xf32>
    %51 = arith.mulf %10, %50 : vector<8x20xf32>
    %c0_29 = arith.constant 0 : index
    %c0_30 = arith.constant 0 : index
    %c0_31 = arith.constant 0 : index
    %52 = vector.load %arg17[%c0_29, %c0_30, %c0_31] : memref<2x8x80xf32, #tpu.memory_space<vmem>>, vector<1x8x80xf32>
    %53 = vector.shape_cast %52 : vector<1x8x80xf32> to vector<8x80xf32>
    %c1 = arith.constant 1 : index
    %c0_32 = arith.constant 0 : index
    %c0_33 = arith.constant 0 : index
    %54 = vector.load %arg17[%c1, %c0_32, %c0_33] : memref<2x8x80xf32, #tpu.memory_space<vmem>>, vector<1x8x80xf32>
    %55 = vector.shape_cast %54 : vector<1x8x80xf32> to vector<8x80xf32>
    %c0_34 = arith.constant 0 : index
    %c0_35 = arith.constant 0 : index
    %56 = vector.load %arg10[%c0_34, %c0_35] : memref<20x80xf32, #tpu.memory_space<vmem>>, vector<20x80xf32>
    %cst_36 = arith.constant dense<0.000000e+00> : vector<8x80xf32>
    %57 = tpu.matmul %51, %56, %cst_36 {dimension_numbers = #tpu.dot_dimension_numbers<[1], [0], [0], [1], [0, 0, 1, 1], [], []>} : vector<8x20xf32>, vector<20x80xf32>, vector<8x80xf32> -> vector<8x80xf32>
    %c0_37 = arith.constant 0 : index
    %c0_38 = arith.constant 0 : index
    %58 = vector.load %arg11[%c0_37, %c0_38] : memref<80x80xf32, #tpu.memory_space<vmem>>, vector<80x80xf32>
    %cst_39 = arith.constant dense<0.000000e+00> : vector<8x80xf32>
    %59 = tpu.matmul %55, %58, %cst_39 {dimension_numbers = #tpu.dot_dimension_numbers<[1], [0], [0], [1], [0, 0, 1, 1], [], []>} : vector<8x80xf32>, vector<80x80xf32>, vector<8x80xf32> -> vector<8x80xf32>
    %60 = arith.addf %57, %59 : vector<8x80xf32>
    %c0_40 = arith.constant 0 : index
    %c0_41 = arith.constant 0 : index
    %61 = vector.load %arg12[%c0_40, %c0_41] : memref<1x80xf32, #tpu.memory_space<vmem>>, vector<1x80xf32>
    %62 = vector.broadcast %61 : vector<1x80xf32> to vector<8x80xf32>
    %63 = arith.addf %60, %62 : vector<8x80xf32>
    %c0_42 = arith.constant 0 : index
    %c0_43 = arith.constant 0 : index
    %64 = vector.load %arg13[%c0_42, %c0_43] : memref<1x80xf32, #tpu.memory_space<vmem>>, vector<1x80xf32>
    %65 = arith.subf %63, %53 : vector<8x80xf32>
    %66 = vector.broadcast %64 : vector<1x80xf32> to vector<8x80xf32>
    %67 = arith.mulf %66, %65 : vector<8x80xf32>
    %68 = arith.addf %53, %67 : vector<8x80xf32>
    %cst_44 = arith.constant 0.000000e+00 : f32
    %69 = vector.broadcast %cst_44 : f32 to vector<8x80xf32>
    %70 = arith.maximumf %68, %69 : vector<8x80xf32>
    %71 = vector.extract_strided_slice %70 {offsets = [0, 0], sizes = [8, 32], strides = [1, 1]} : vector<8x80xf32> to vector<8x32xf32>
    %c0_45 = arith.constant 0 : index
    %c0_46 = arith.constant 0 : index
    %72 = vector.load %arg14[%c0_45, %c0_46] : memref<32x20xf32, #tpu.memory_space<vmem>>, vector<32x20xf32>
    %cst_47 = arith.constant dense<0.000000e+00> : vector<8x20xf32>
    %73 = tpu.matmul %71, %72, %cst_47 {dimension_numbers = #tpu.dot_dimension_numbers<[1], [0], [0], [1], [0, 0, 1, 1], [], []>} : vector<8x32xf32>, vector<32x20xf32>, vector<8x20xf32> -> vector<8x20xf32>
    %c0_48 = arith.constant 0 : index
    %c0_49 = arith.constant 0 : index
    %74 = vector.load %arg15[%c0_48, %c0_49] : memref<1x20xf32, #tpu.memory_space<vmem>>, vector<1x20xf32>
    %75 = vector.broadcast %74 : vector<1x20xf32> to vector<8x20xf32>
    %76 = arith.addf %73, %75 : vector<8x20xf32>
    %77 = math.tanh %76 : vector<8x20xf32>
    %c0_50 = arith.constant 0 : index
    %c0_51 = arith.constant 0 : index
    %c0_52 = arith.constant 0 : index
    %78 = vector.load %arg17[%c0_50, %c0_51, %c0_52] : memref<2x8x80xf32, #tpu.memory_space<vmem>>, vector<1x8x80xf32>
    %79 = vector.shape_cast %78 : vector<1x8x80xf32> to vector<8x80xf32>
    %80 = vector.shape_cast %68 : vector<8x80xf32> to vector<1x8x80xf32>
    tpu.vector_store %arg17[%c0_50, %c0_51, %c0_52], %80 {strides = array<i32>} : memref<2x8x80xf32, #tpu.memory_space<vmem>>, vector<1x8x80xf32>,
    %c1_53 = arith.constant 1 : index
    %c0_54 = arith.constant 0 : index
    %c0_55 = arith.constant 0 : index
    %81 = vector.load %arg17[%c1_53, %c0_54, %c0_55] : memref<2x8x80xf32, #tpu.memory_space<vmem>>, vector<1x8x80xf32>
    %82 = vector.shape_cast %81 : vector<1x8x80xf32> to vector<8x80xf32>
    %83 = vector.shape_cast %70 : vector<8x80xf32> to vector<1x8x80xf32>
    tpu.vector_store %arg17[%c1_53, %c0_54, %c0_55], %83 {strides = array<i32>} : memref<2x8x80xf32, #tpu.memory_space<vmem>>, vector<1x8x80xf32>,
    %c0_56 = arith.constant 0 : index
    %c0_57 = arith.constant 0 : index
    %84 = vector.load %arg18[%c0_56, %c0_57] : memref<8x20xf32, #tpu.memory_space<vmem>>, vector<8x20xf32>
    tpu.vector_store %arg18[%c0_56, %c0_57], %77 {strides = array<i32>} : memref<8x20xf32, #tpu.memory_space<vmem>>, vector<8x20xf32>,
    %c0_58 = arith.constant 0 : index
    %c0_59 = arith.constant 0 : index
    %c0_60 = arith.constant 0 : index
    %85 = vector.load %arg16[%c0_58, %c0_59, %c0_60] : memref<1x8x40xf32, #tpu.memory_space<vmem>>, vector<1x8x20xf32>
    %86 = vector.shape_cast %85 : vector<1x8x20xf32> to vector<8x20xf32>
    %87 = vector.shape_cast %77 : vector<8x20xf32> to vector<1x8x20xf32>
    tpu.vector_store %arg16[%c0_58, %c0_59, %c0_60], %87 {strides = array<i32>} : memref<1x8x40xf32, #tpu.memory_space<vmem>>, vector<1x8x20xf32>,
    %c0_61 = arith.constant 0 : index
    %c0_62 = arith.constant 0 : index
    %c20 = arith.constant 20 : index
    %88 = vector.load %arg16[%c0_61, %c0_62, %c20] : memref<1x8x40xf32, #tpu.memory_space<vmem>>, vector<1x8x20xf32>
    %89 = vector.shape_cast %88 : vector<1x8x20xf32> to vector<8x20xf32>
    %90 = vector.shape_cast %50 : vector<8x20xf32> to vector<1x8x20xf32>
    tpu.vector_store %arg16[%c0_61, %c0_62, %c20], %90 {strides = array<i32>} : memref<1x8x40xf32, #tpu.memory_space<vmem>>, vector<1x8x20xf32>,
    return
  }
  func.func @transform_0(%arg0: i32) -> (i32, i32, i32) {
    %c0_i32 = arith.constant 0 : i32
    %c0_i32_0 = arith.constant 0 : i32
    %c0_i32_1 = arith.constant 0 : i32
    return %arg0, %c0_i32, %c0_i32_0 : i32, i32, i32
  }
  func.func @transform_1(%arg0: i32) -> (i32, i32) {
    %c0_i32 = arith.constant 0 : i32
    %c0_i32_0 = arith.constant 0 : i32
    %c0_i32_1 = arith.constant 0 : i32
    return %c0_i32, %c0_i32_0 : i32, i32
  }
  func.func @transform_2(%arg0: i32) -> (i32, i32, i32) {
    %c0_i32 = arith.constant 0 : i32
    %c0_i32_0 = arith.constant 0 : i32
    %c0_i32_1 = arith.constant 0 : i32
    %c0_i32_2 = arith.constant 0 : i32
    return %c0_i32, %c0_i32_0, %c0_i32_1 : i32, i32, i32
  }
  func.func @transform_3(%arg0: i32) -> (i32, i32) {
    %c0_i32 = arith.constant 0 : i32
    %c0_i32_0 = arith.constant 0 : i32
    %c0_i32_1 = arith.constant 0 : i32
    return %c0_i32, %c0_i32_0 : i32, i32
  }
  func.func @transform_4(%arg0: i32) -> (i32, i32) {
    %c0_i32 = arith.constant 0 : i32
    %c0_i32_0 = arith.constant 0 : i32
    %c0_i32_1 = arith.constant 0 : i32
    return %c0_i32, %c0_i32_0 : i32, i32
  }
  func.func @transform_5(%arg0: i32) -> (i32, i32) {
    %c0_i32 = arith.constant 0 : i32
    %c0_i32_0 = arith.constant 0 : i32
    %c0_i32_1 = arith.constant 0 : i32
    return %c0_i32, %c0_i32_0 : i32, i32
  }
  func.func @transform_6(%arg0: i32) -> (i32, i32) {
    %c0_i32 = arith.constant 0 : i32
    %c0_i32_0 = arith.constant 0 : i32
    %c0_i32_1 = arith.constant 0 : i32
    return %c0_i32, %c0_i32_0 : i32, i32
  }
  func.func @transform_7(%arg0: i32) -> (i32, i32) {
    %c0_i32 = arith.constant 0 : i32
    %c0_i32_0 = arith.constant 0 : i32
    %c0_i32_1 = arith.constant 0 : i32
    return %c0_i32, %c0_i32_0 : i32, i32
  }
  func.func @transform_8(%arg0: i32) -> (i32, i32) {
    %c0_i32 = arith.constant 0 : i32
    %c0_i32_0 = arith.constant 0 : i32
    %c0_i32_1 = arith.constant 0 : i32
    return %c0_i32, %c0_i32_0 : i32, i32
  }
  func.func @transform_9(%arg0: i32) -> (i32, i32) {
    %c0_i32 = arith.constant 0 : i32
    %c0_i32_0 = arith.constant 0 : i32
    %c0_i32_1 = arith.constant 0 : i32
    return %c0_i32, %c0_i32_0 : i32, i32
  }
  func.func @transform_10(%arg0: i32) -> (i32, i32) {
    %c0_i32 = arith.constant 0 : i32
    %c0_i32_0 = arith.constant 0 : i32
    %c0_i32_1 = arith.constant 0 : i32
    return %c0_i32, %c0_i32_0 : i32, i32
  }
  func.func @transform_11(%arg0: i32) -> (i32, i32) {
    %c0_i32 = arith.constant 0 : i32
    %c0_i32_0 = arith.constant 0 : i32
    %c0_i32_1 = arith.constant 0 : i32
    return %c0_i32, %c0_i32_0 : i32, i32
  }
  func.func @transform_12(%arg0: i32) -> (i32, i32) {
    %c0_i32 = arith.constant 0 : i32
    %c0_i32_0 = arith.constant 0 : i32
    %c0_i32_1 = arith.constant 0 : i32
    return %c0_i32, %c0_i32_0 : i32, i32
  }
  func.func @transform_13(%arg0: i32) -> (i32, i32) {
    %c0_i32 = arith.constant 0 : i32
    %c0_i32_0 = arith.constant 0 : i32
    %c0_i32_1 = arith.constant 0 : i32
    return %c0_i32, %c0_i32_0 : i32, i32
  }
  func.func @transform_14(%arg0: i32) -> (i32, i32) {
    %c0_i32 = arith.constant 0 : i32
    %c0_i32_0 = arith.constant 0 : i32
    %c0_i32_1 = arith.constant 0 : i32
    return %c0_i32, %c0_i32_0 : i32, i32
  }
  func.func @transform_15(%arg0: i32) -> (i32, i32, i32) {
    %c0_i32 = arith.constant 0 : i32
    %c0_i32_0 = arith.constant 0 : i32
    %c0_i32_1 = arith.constant 0 : i32
    return %arg0, %c0_i32, %c0_i32_0 : i32, i32, i32
  }
  func.func @transform_16(%arg0: i32) -> (i32, i32, i32) {
    %c0_i32 = arith.constant 0 : i32
    %c0_i32_0 = arith.constant 0 : i32
    %c0_i32_1 = arith.constant 0 : i32
    %c0_i32_2 = arith.constant 0 : i32
    return %c0_i32, %c0_i32_0, %c0_i32_1 : i32, i32, i32
  }
}

</mosaic_0001>

<bundles_post_ra>
// kernel: _lambda_.1
= control target key start
LH: loop header
LB: loop body
LE: loop exit
PB: predicated region body
PF: predicated region fallthrough
CT: control target
= control target key end

     0   :  { %s1702_s0 = inlined_call_operand.hbm [shape: f32[8,8,20], index: 0, kind: input, shape index: {}]   ;;  %s1703_s1 = inlined_call_operand.vmem [shape: f32[8,20], index: 1, kind: input, shape index: {}]   ;;  %s1704_s2 = inlined_call_operand.hbm [shape: f32[2,8,80], index: 2, kind: input, shape index: {}]   ;;  %s1705_s3 = inlined_call_operand.vmem [shape: f32[20,100], index: 3, kind: input, shape index: {}]   ;;  %s1706_s4 = inlined_call_operand.vmem [shape: f32[1,100], index: 4, kind: input, shape index: {}]   ;;  %s1707_s5 = inlined_call_operand.vmem [shape: f32[100,100], index: 5, kind: input, shape index: {}]   ;;  %s1708_s6 = inlined_call_operand.vmem [shape: f32[1,100], index: 6, kind: input, shape index: {}]   ;;  %s1709_s7 = inlined_call_operand.vmem [shape: f32[100,20], index: 7, kind: input, shape index: {}]   ;;  %s1710_s8 = inlined_call_operand.vmem [shape: f32[1,20], index: 8, kind: input, shape index: {}]   ;;  %s1711_s9 = inlined_call_operand.vmem [shape: f32[20,80], index: 9, kind: input, shape index: {}]   ;;  %s1712_s10 = inlined_call_operand.hbm [shape: f32[80,80], index: 10, kind: input, shape index: {}]   ;;  %s1713_s11 = inlined_call_operand.vmem [shape: f32[1,80], index: 11, kind: input, shape index: {}]   ;;  %s1714_s12 = inlined_call_operand.vmem [shape: f32[1,80], index: 12, kind: input, shape index: {}]   ;;  %s1715_s13 = inlined_call_operand.vmem [shape: f32[32,20], index: 13, kind: input, shape index: {}]   ;;  %s1716_s14 = inlined_call_operand.vmem [shape: f32[1,20], index: 14, kind: input, shape index: {}]   ;;  %s1717_s15 = inlined_call_operand.hbm [shape: f32[8,8,40], index: 15, kind: output, shape index: {0}]   ;;  %s1718_s16 = inlined_call_operand.hbm [shape: f32[2,8,80], index: 16, kind: output, shape index: {1}]  }
   0x1   :  { %1729 = sst [smem:[#allocation22_spill]] %s1702_s0 }
   0x2   :  { %1730 = sst [smem:[#allocation23_spill]] %s1703_s1 }
   0x3   :  { %1731 = sst [smem:[#allocation24_spill]] %s1704_s2 }
   0x4   :  { %1732 = sst [smem:[#allocation25_spill]] %s1705_s3 }
   0x5   :  { %1733 = sst [smem:[#allocation26_spill]] %s1712_s10 }
   0x6   :  { %1734 = sst [smem:[#allocation27_spill]] %s1716_s14 }
   0x7   :  { %1735 = sst [smem:[#allocation28_spill]] %s1717_s15 }
   0x8   :  { %1736 = sst [smem:[#allocation29_spill]] %s1718_s16 }
   0x9   :  { %22 = vsyncpa [#allocation4], 0 }
   0xa   :  { %24 = vsyncpa [#allocation4 + $0x1], 0 }
   0xb   :  { %25 = vsyncpa [#allocation7], 0 }
   0xc   :  { %26 = vsyncpa [#allocation5], 0 }
   0xd   :  { %28 = vsyncpa [#allocation5 + $0x1], 0 }
   0xe   :  { %29 = vsyncpa [#allocation11], 0  ;;  %s1391_s21 = smov 0   ;;  %s1393_s22 = smov 0  }
   0xf   :  { %s1395_s23 = smov 0   ;;  %s1397_s24 = smov 0  }
  0x10 LB: > { %1737 = sst [smem:[#allocation16_spill]] %s1284_s21  ;;  %s1415_s28 = sadd.s32 4294967295, %s1296_s24   ;;  %s1296_s24 = sphi %s1397_s24, %s1765_s24   ;;  %s1292_s23 = sphi %s1395_s23, %s1767_s23   ;;  %s1288_s22 = sphi %s1393_s22, %s1769_s22   ;;  %s1284_s21 = sphi %s1391_s21, %s1768_s21  }
  0x11   : > { %1738 = sst [smem:[#allocation17_spill]] %s1292_s23  ;;  %p985_p0 = scmp.ge.s32.totalorder %s1296_s24, 1 }
  0x12   : > { %s1739_s2 = sld [smem:[#allocation24_spill]]  ;;  %p56_p1 = scmp.eq.s32.totalorder %s1415_s28, 0 }
  0x13   : > { %p407_p2 = scmp.lt.s32.totalorder %s1296_s24, 9  ;;  %s1298_s30 = smov [#allocation6]  }
  0x14   : > { %s423_s0 = sshll.u32 %s1298_s30, 4  ;;  %s1741_s10 = sld [smem:[#allocation26_spill]]  ;;  %s424_s0 = int_to_ptr.vmem [resolvable:$true] %s423_s0 }
  0x15   : > { %p1421_p4 = pnand %p985_p0, %p407_p2  ;;  %s1299_s20 = smov [#allocation8]  }
  0x16   : > { %s458_s25 = sshll.u32 %s1299_s20, 4  ;;  %s1300_s26 = smov 128   ;;  %s459_s25 = int_to_ptr.vmem [resolvable:$true] %s458_s25 }
  0x17   : > { %p1029_p5 = pneg %p1421_p4  ;;  %s1301_s30 = smov 8  }
  0x18   : > { %s421_s27 = sshll.u32 %s1739_s2, 4  ;;  %s984_s17 = sadd.s32 4294967294, %s1296_s24   ;;  %s422_s27 = int_to_ptr.hbm [resolvable:$true] %s421_s27 }
  0x19   : > { %p1030_p6 = pnand %p1029_p5, %p56_p1  ;;  %s1434_s18 = sadd.s32 1, %s1296_s24  }
  0x1a   : > { %s456_s19 = sshll.u32 %s1741_s10, 4  ;;  %1742 = sst [smem:[#allocation18_spill]] %s1434_s18  ;;  %s457_s19 = int_to_ptr.hbm [resolvable:$true] %s456_s19 }
  0x1b   : > { %1032 = dma.hbm_to_vmem [thread:$0]  (!%p1030_p6), %s422_s27, 256, %s424_s0, [#allocation7], %s1300_s26, %s1300_s26, %s1301_s30  }
  0x1c   : > { %1035 = dma.hbm_to_vmem [thread:$0]  (!%p1030_p6), %s457_s19, 1280, %s459_s25, [#allocation7], %s1300_s26, %s1300_s26, %s1301_s30  }
  0x1d   : > { %s39_s2 = ssub.s32 %s1296_s24, %s1434_s18  ;;  %s42_s10 = sadd.s32 1, %s1292_s23 }
  0x1e   : > { %p40_p7 = scmp.eq.s32.totalorder %s39_s2, 0  ;;  %p49_p8 = scmp.ne.s32.totalorder %s1292_s23, %s1288_s22 }
  0x1f   : > { %p50_p9 = scmp.eq.s32.totalorder %s1296_s24, 0  ;;  %p55_p10 = scmp.ne.s32.totalorder %s1288_s22, %s1284_s21 }
  0x20   : > { %s1445_s20 = scalar_select %p40_p7, %s1292_s23, %s42_s10  }
  0x21   : > { %p1447_p11 = por %p50_p9, %p49_p8  ;;  %p1453_p12 = por %p56_p1, %p55_p10 }
  0x22   : > { %1743 = sst [smem:[#allocation19_spill]] %s1445_s20  ;;  %p1728_p13 = scmp.eq.s32.totalorder %s1415_s28, 7 }
  0x23   : > { %p379_p0 = scmp.eq.s32.totalorder %s984_s17, 7  ;;  %p1046_p2 = scmp.lt.s32.totalorder %s1296_s24, 8 }
  0x24   : > { %s484_s19 = sand.u32 1, %s1292_s23   ;;  %p1462_p5 = por %p1728_p13, %p49_p8 }
  0x25   : > { %p1466_p6 = por %p379_p0, %p55_p10  ;;  %s989_s25 = sshll.u32 %s484_s19, 3 }
  0x26   : > { %s1746_s2 = scalar_select %p1462_p5, 1, 0 }
  0x27   : > { %s1748_s10 = scalar_select %p1466_p6, 1, 0 }
  0x28   : > { %1747 = sst [smem:[#allocation20_spill]] %s1746_s2  ;;  %s990_s26 = sshll.u32 %s1296_s24, 3 }
  0x29   : > { %1749 = sst [smem:[#allocation21_spill]] %s1748_s10  ;;  %s488_s15 = scalar_lea.vmem [#allocation3], %s989_s25 }
  0x2a   : > { %s1750_s18 = sld [smem:[#allocation22_spill]]  ;;  %s496_s14 = sshll.u32 %s488_s15, 4  ;;  %s497_s14 = int_to_ptr.vmem [resolvable:$true] %s496_s14 }
  0x2b   : > { %p1476_p7 = pnand %p1046_p2, %p1447_p11  ;;  %s485_s2 = scalar_lea.sflag [#allocation4], %s484_s19 }
  0x2d   : > { %p1168_p9 = pneg %p1476_p7 }
  0x30   : > { %s492_s21 = scalar_lea.hbm %s1750_s18, %s990_s26 }
  0x31   : > { %s494_s17 = sshll.u32 %s492_s21, 4  ;;  %s1171_s21 = scalar_lea.hbm %s1750_s18, 64  ;;  %s495_s17 = int_to_ptr.hbm [resolvable:$true] %s494_s17 }
  0x32   : > { %s1164_s16 = sshra.s32 %s495_s17, 4  ;;  %s1165_s16 = int_to_ptr.hbm [resolvable:$true] %s1164_s16 }
  0x33   : > { %s1166_s10 = scalar_lea.hbm %s1165_s16, 8  ;;  %p1172_p11 = scmp.lt.s32.totalorder %s1165_s16, %s1750_s18 }
  0x34   : > { %p1167_p8 = scmp.ne.s32.totalorder %s1165_s16, %s1166_s10  ;;  %p1173_p2 = scmp.lt.s32.totalorder %s1171_s21, %s1166_s10 }
  0x36   : > { %p1169_p10 = pnand %p1168_p9, %p1167_p8  ;;  %p1174_p13 = por %p1173_p2, %p1172_p11 }
  0x38   : > { %p1170_p0 = pneg %p1169_p10 }
  0x3a   : > { %p1175_p3 = pnand %p1174_p13, %p1170_p0 }
  0x3c   : > { %1178 = shalt.err (!%p1175_p3)
}
  0x3d   : > { %1039 = dma.hbm_to_vmem [thread:$0]  (!%p1476_p7), %s495_s17, 128, %s497_s14, %s485_s2  }
  0x3e   : > { %505 = sbr.rel (%p1421_p4) target bundleno = 1031 (0x407), region = 80  ;;  %s1493_s19 = sand.u32 (!%p1421_p4), 1, %s1288_s22  }
  0x3f   : > { %s992_s26 = sshll.u32 (!%p1421_p4), %s1493_s19, 3  ;;  %s508_s30 = scalar_lea.sflag (!%p1421_p4), [#allocation4], %s1493_s19 }
  0x40   : > { %s511_s20 = scalar_lea.vmem (!%p1421_p4), [#allocation3], %s992_s26 }
  0x43   : > { %1267 = dma.done.wait (%p1453_p12), %s508_s30, 128  }
  0x44   : > { %1269 = vsyncadd (%p1453_p12), %s508_s30, 4294967168 }
  0x45   : > { %1271 = dma.done.wait (%p56_p1), [#allocation7], 1536  }
  0x46   : > { %1273 = vsyncadd (%p56_p1), [#allocation7], 4294965760  ;;  %s1505_s14 = scalar_lea.vmem [#allocation9], %s992_s26  ;;  %p1752_p3 = scmp.ne.s32.totalorder %s1415_s28, 0 }
  0x47   : > { %s1753_s1 = sld [smem:[#allocation23_spill]] (!%p1752_p3) }
  0x48   : > { %574 = sbr.rel (%p1752_p3) target bundleno = 81 (0x51), region = 96 }
  0x4d   : > { %v575_v0 = vld [vmem:[#allocation6] sm:$0xff]  ;;  %vm577_vm0 = vcmask 654336   ;;  %v576_v1 = vld [vmem:[#allocation6 + $0x8] sm:$0xff]  ;;  %vm581_vm1 = vcmask 162816  }
  0x4e   : > { %v580_v2 = vld [vmem:[%s1753_s1] sm:$0xff]  ;;  %578 = vst.msk [vmem:[#allocation10] sm:$0xff] %vm577_vm0, %v575_v0 }
  0x4f   : > { %579 = vst.msk [vmem:[#allocation10 + $0x8] sm:$0xff] %vm577_vm0, %v576_v1 }
  0x50   : > { %582 = vst.msk [vmem:[#allocation2] sm:$0xff] %vm581_vm1, %v580_v2 }
  0x51 PF: > { %s1754_s3 = sld [smem:[#allocation25_spill]]  ;;  %vm599_vm2 = vcmask 1043456   ;;  %v583_v5 = vld [vmem:[%s511_s20] sm:$0xff]  ;;  %v636_v7 = vld [vmem:[%s1707_s5 + $0x60] sm:$0xf]  ;;  %v635_v11 = vld [vmem:[%s1707_s5 + $0x58] sm:$0xff]  ;;  %v712_v45 = vlaneseq }
  0x52   : > { %v584_v9 = vmul.f32 0.8, %v583_v5  ;;  %999 = vmatpush.msk.msra.mxu1 %vm599_vm2, %v636_v7  ;;  %vm595_vm3 = vcmask 162816   ;;  %v634_v12 = vld [vmem:[%s1707_s5 + $0x50] sm:$0xff]  ;;  %v633_v14 = vld [vmem:[%s1707_s5 + $0x48] sm:$0xff]  ;;  %v632_v15 = vld [vmem:[%s1707_s5 + $0x40] sm:$0xff] }
  0x53   : > { %v631_v16 = vld [vmem:[%s1707_s5 + $0x38] sm:$0xff]  ;;  %v630_v17 = vld [vmem:[%s1707_s5 + $0x30] sm:$0xff]  ;;  %v629_v18 = vld [vmem:[%s1707_s5 + $0x28] sm:$0xff]  ;;  %vm641_vm4 = vcmask 818176   ;;  %v713_v46 = vand.u32 127, %v712_v45  ;;  %vm747_vm6 = vcmask 654336  }
  0x54   : > { %652 = vmatpush.msra.mxu1 %v635_v11  ;;  %v628_v19 = vld [vmem:[%s1707_s5 + $0x20] sm:$0xff]  ;;  %v627_v20 = vld [vmem:[%s1707_s5 + $0x18] sm:$0xff]  ;;  %v626_v21 = vld [vmem:[%s1707_s5 + $0x10] sm:$0xff]  ;;  %s1302_s29 = smov 20   ;;  %vm818_vm7 = vcmask 261120   ;;  %s1303_s23 = smov [#allocation10]  }
  0x55   : > { %v625_v22 = vld [vmem:[%s1707_s5 + $0x8] sm:$0xff]  ;;  %v624_v23 = vld [vmem:[%s1707_s5] sm:$0xff]  ;;  %v680_v25 = vld [vmem:[%s1709_s7 + $0x58] sm:$0xff]  ;;  %vm714_vm5 = vcmp.ge.s32.totalorder %v713_v46, 7  ;;  %s1755_s10 = sld [smem:[#allocation29_spill]]  ;;  %s1304_s15 = smov 128  }
  0x56   : > { %653 = vmatpush.msra.mxu1 %v634_v12  ;;  %v681_v24 = vld [vmem:[%s1709_s7 + $0x60] sm:$0xf]  ;;  %v679_v26 = vld [vmem:[%s1709_s7 + $0x50] sm:$0xff]  ;;  %v678_v27 = vld [vmem:[%s1709_s7 + $0x48] sm:$0xff]  ;;  %s1305_s21 = smov 8   ;;  %p1756_p1 = scmp.eq.s32.totalorder %s1415_s28, 7 }
  0x57   : > { %v590_v3 = vld [vmem:[%s1754_s3 + $0x10] sm:$0xf]  ;;  %v589_v4 = vld [vmem:[%s1754_s3 + $0x8] sm:$0xff]  ;;  %v585_v6 = vld [vmem:[#allocation2] sm:$0xff]  ;;  %1001 = vmatpush.msk.msra.mxu2 %vm599_vm2, %v681_v24  ;;  %s1757_s26 = sld [smem:[#allocation27_spill]]  ;;  %s1008_s30 = sshll.u32 %s1415_s28, 3 }
  0x58   : > { %997 = vmatpush.msk.msra.mxu0 %vm599_vm2, %v590_v3  ;;  %v588_v8 = vld [vmem:[%s1754_s3] sm:$0xff]  ;;  %v586_v10 = vmul.f32 0.2, %v585_v6  ;;  %654 = vmatpush.msra.mxu1 %v633_v14  ;;  %v676_v29 = vld [vmem:[%s1709_s7 + $0x38] sm:$0xff]  ;;  %v675_v30 = vld [vmem:[%s1709_s7 + $0x30] sm:$0xff]  ;;  %s866_s1 = sshll.u32 %s1505_s14, 4  ;;  %s867_s1 = int_to_ptr.vmem [resolvable:$true] %s866_s1 }
  0x59   : > { %696 = vmatpush.msra.mxu2 %v680_v25  ;;  %v677_v28 = vld [vmem:[%s1709_s7 + $0x40] sm:$0xff]  ;;  %v674_v31 = vld [vmem:[%s1709_s7 + $0x28] sm:$0xff]  ;;  %v672_v33 = vld [vmem:[%s1709_s7 + $0x18] sm:$0xff]  ;;  %vm851_vm8 = vcmask 326816  }
  0x5a   : > { %617 = vmatpush.msra.mxu0 %v589_v4  ;;  %v1532_v13 = vadd.f32 %v586_v10, %v584_v9  ;;  %655 = vmatpush.msra.mxu1 %v632_v15  ;;  %v673_v32 = vld [vmem:[%s1709_s7 + $0x20] sm:$0xff]  ;;  %v671_v38 = vld [vmem:[%s1709_s7 + $0x10] sm:$0xff]  ;;  %v670_v39 = vld [vmem:[%s1709_s7 + $0x8] sm:$0xff] }
  0x5b   : > { %697 = vmatpush.msra.mxu2 %v679_v26  ;;  %v1092_v34 = vld [vmem:[%s1706_s4] ss:$0 sm:$0xff]  ;;  %v746_v52 = vld [vmem:[#allocation8 + $0x48] sm:$0xff]  ;;  %v745_v53 = vld [vmem:[#allocation8 + $0x40] sm:$0xff]  ;;  %s879_s17 = sshll.u32 %s1755_s10, 4  ;;  %s880_s17 = int_to_ptr.hbm [resolvable:$true] %s879_s17 }
  0x5c   : > { %618 = vmatpush.msra.mxu0 %v588_v8  ;;  %656 = vmatpush.msra.mxu1 %v631_v16  ;;  %v669_v40 = vld [vmem:[%s1709_s7] sm:$0xff]  ;;  %v743_v55 = vld [vmem:[#allocation8 + $0x30] sm:$0xff]  ;;  %v742_v56 = vld [vmem:[#allocation8 + $0x28] sm:$0xff] }
  0x5d   : > { %998 = vmatmul.msk.f32.vlgmr.msra.gmra.mxu0 %vm595_vm3, %v1532_v13  ;;  %698 = vmatpush.msra.mxu2 %v678_v27  ;;  %v1093_v41 = vld [vmem:[%s1708_s6] ss:$0 sm:$0xff]  ;;  %v741_v57 = vld [vmem:[#allocation8 + $0x20] sm:$0xff]  ;;  %v739_v1 = vld [vmem:[#allocation8 + $0x10] sm:$0xff] }
  0x5e   : > { %657 = vmatpush.msra.mxu1 %v630_v17  ;;  %v1094_v47 = vld [vmem:[%s1710_s8] ss:$0 sm:$0xff]  ;;  %757 = vmatpush.msra.mxu3 %v746_v52  ;;  %v736_v2 = vld [vmem:[%s1711_s9 + $0x10] sm:$0xf]  ;;  %v735_v4 = vld [vmem:[%s1711_s9 + $0x8] sm:$0xff] }
  0x5f   : > { %699 = vmatpush.msra.mxu2 %v677_v28  ;;  %v744_v54 = vld [vmem:[#allocation8 + $0x38] sm:$0xff]  ;;  %v738_v3 = vld [vmem:[#allocation8 + $0x8] sm:$0xff]  ;;  %1004 = vmatpush.msk.msrb.mxu0 %vm599_vm2, %v736_v2  ;;  %v737_v6 = vld [vmem:[#allocation8] sm:$0xff] }
  0x60   : > { %658 = vmatpush.msra.mxu1 %v629_v18  ;;  %758 = vmatpush.msra.mxu3 %v745_v53  ;;  %v740_v0 = vld [vmem:[#allocation8 + $0x18] sm:$0xff]  ;;  %v733_v7 = vld [vmem:[#allocation10 + $0x8] sm:$0xff]  ;;  %v813_v15 = vld [vmem:[%s1715_s13 + $0x18] sm:$0xff] }
  0x61   : > { %700 = vmatpush.msra.mxu2 %v676_v29  ;;  %v734_v5 = vld [vmem:[%s1711_s9] sm:$0xff]  ;;  %791 = vmatpush.msrb.mxu0 %v735_v4  ;;  %v812_v16 = vld [vmem:[%s1715_s13 + $0x10] sm:$0xff]  ;;  %v811_v17 = vld [vmem:[%s1715_s13 + $0x8] sm:$0xff] }
  0x62   : > { %659 = vmatpush.msra.mxu1 %v628_v19  ;;  %759 = vmatpush.msra.mxu3 %v744_v54  ;;  %v1095_v19 = vld [vmem:[%s1713_s11] ss:$0 sm:$0xff] }
  0x63   : > { %701 = vmatpush.msra.mxu2 %v675_v30  ;;  %792 = vmatpush.msrb.mxu0 %v734_v5  ;;  %v1096_v24 = vld [vmem:[%s1714_s12] ss:$0 sm:$0xff] }
  0x64   : > { %660 = vmatpush.msra.mxu1 %v627_v20  ;;  %760 = vmatpush.msra.mxu3 %v743_v55  ;;  %v1097_v29 = vld [vmem:[%s1757_s26] ss:$0 sm:$0xff] }
  0x65   : > { %702 = vmatpush.msra.mxu2 %v674_v31  ;;  %834 = vmatpush.msra.mxu0 %v813_v15 }
  0x66   : > { %661 = vmatpush.msra.mxu1 %v626_v21  ;;  %761 = vmatpush.msra.mxu3 %v742_v56 }
  0x67   : > { %703 = vmatpush.msra.mxu2 %v673_v32  ;;  %835 = vmatpush.msra.mxu0 %v812_v16 }
  0x68   : > { %662 = vmatpush.msra.mxu1 %v625_v22  ;;  %762 = vmatpush.msra.mxu3 %v741_v57  ;;  %v731_v22 = vld [vmem:[#allocation10] sm:$0xff] }
  0x69   : > { %704 = vmatpush.msra.mxu2 %v672_v33  ;;  %836 = vmatpush.msra.mxu0 %v811_v17 }
  0x6a   : > { %663 = vmatpush.msra.mxu1 %v624_v23  ;;  %763 = vmatpush.msra.mxu3 %v740_v0 }
  0x6b   : > { %705 = vmatpush.msra.mxu2 %v671_v38 }
  0x6c   : > { %764 = vmatpush.msra.mxu3 %v739_v1 }
  0x6d   : > { %706 = vmatpush.msra.mxu2 %v670_v39 }
  0x6e   : > { %765 = vmatpush.msra.mxu3 %v738_v3 }
  0x6f   : > { %707 = vmatpush.msra.mxu2 %v669_v40 }
  0x70   : > { %766 = vmatpush.msra.mxu3 %v737_v6 }
  0x71   : > { %1003 = vmatmul.msk.f32.vlgmr.msra.gmra.mxu3 %vm747_vm6, %v733_v7 }
  0xda   : > { %v620_v35 = vpop.f32.mrf.mxu0 }
  0xdb   : > { %v621_v36 = vadd.f32 %v1092_v34, %v620_v35 }
  0xdd   : > { %v623_v37 = vmax.f32 %v621_v36, 0.0 }
  0xdf   : > { %1000 = vmatmul.msk.f32.vlgmr.msra.gmra.mxu1 %vm641_vm4, %v623_v37 }
  0xf4   : > { %v768_v18 = vpop.f32.mrf.mxu3 }
 0x15c   : > { %v665_v42 = vpop.f32.mrf.mxu1 }
 0x15d   : > { %v666_v43 = vadd.f32 %v1093_v41, %v665_v42 }
 0x15f   : > { %v668_v44 = vmax.f32 %v666_v43, 0.0 }
 0x161   : > { %1002 = vmatmul.msk.f32.vlgmr.msra.gmra.mxu2 %vm641_vm4, %v668_v44 }
 0x1e4   : > { %v709_v48 = vpop.f32.mrf.mxu2 }
 0x1e5   : > { %v710_v49 = vadd.f32 %v1094_v47, %v709_v48 }
 0x1e7   : > { %v715_v50 = vsel %vm714_vm5, %v710_v49, -1e+30 }
 0x1e8   : > { %v716_v51 = vsel %vm595_vm3, %v715_v50, -inf }
 0x1e9   : > { %717 = vmax.xlane.f32.xlu0 %v716_v51 }
 0x25c   : > { %v718_v58 = vpop.xlane.xlu0 %717 }
 0x25d   : > { %v719_v59 = vsub.f32 %v715_v50, %v718_v58 }
 0x25f   : > { %v720_v60 = vmul.f32 1.442695, %v719_v59 }
 0x261   : > { %1098 = vpow2.f32 %v720_v60 }
 0x267   : > { %v1099_v61 = vpop.eup %1098 }
 0x268   : > { %v722_v62 = vsel %vm714_vm5, %v1099_v61, 0.0 }
 0x269   : > { %v723_v63 = vsel %vm595_vm3, %v722_v62, 0.0 }
 0x26a   : > { %724 = vadd.xlane.f32.xlu0 %v723_v63 }
 0x2dd   : > { %v725_v8 = vpop.xlane.xlu0 %724 }
 0x2de   : > { %1100 = vrcp.f32 %v725_v8 }
 0x2e4   : > { %v1101_v9 = vpop.eup %1100 }
 0x2e5   : > { %v727_v10 = vmul.f32 %v1101_v9, %v722_v62 }
 0x2e7   : > { %v728_v11 = vmul.f32 34.0, %v727_v10 }
 0x2e9   : > { %v729_v12 = vsel %vm714_vm5, %v728_v11, 1.0 }
 0x2ea   : > { %848 = vrot.lane.b32.xlu1 %v729_v12, %s1302_s29  ;;  %v730_v14 = vmul.f32 %v729_v12, %v1532_v13  ;;  %v810_v13 = vld [vmem:[%s1715_s13] sm:$0xff]  ;;  %s877_s29 = sshll.u32 %s1303_s23, 4  ;;  %s1758_s23 = sld [smem:[#allocation28_spill]]  ;;  %s878_s29 = int_to_ptr.vmem [resolvable:$true] %s877_s29 }
 0x2eb   : > { %837 = vmatpush.msra.mxu0 %v810_v13 }
 0x2ec   : > { %1005 = vmatmul.msk.f32.vlgmr.msrb.gmra.mxu0 %vm595_vm3, %v730_v14 }
 0x2f0   : > { %s1759_s0 = smov %s1758_s23  ;;  %s864_s2 = scalar_lea.hbm %s1758_s23, %s1008_s30 }
 0x2f1   : > { %s868_s3 = sshll.u32 %s864_s2, 4  ;;  %s1242_s27 = scalar_lea.hbm %s1759_s0, 64  ;;  %s869_s3 = int_to_ptr.hbm [resolvable:$true] %s868_s3 }
 0x35c   : > { %v849_v33 = vpop.permute.xlu1 %848 }
 0x369   : > { %v794_v20 = vpop.f32.mrf.mxu0 }
 0x36a   : > { %v795_v21 = vadd.f32 %v794_v20, %v768_v18 }
 0x36c   : > { %v801_v23 = vadd.f32 %v1095_v19, %v795_v21 }
 0x36e   : > { %v803_v25 = vsub.f32 %v801_v23, %v731_v22 }
 0x370   : > { %v807_v26 = vmul.f32 %v1096_v24, %v803_v25 }
 0x372   : > { %v808_v27 = vadd.f32 %v807_v26, %v731_v22 }
 0x374   : > { %v809_v28 = vmax.f32 %v808_v27, 0.0  ;;  %843 = vst.msk [vmem:[#allocation10] sm:$0xff] %vm747_vm6, %v808_v27 }
 0x376   : > { %844 = vst.msk [vmem:[#allocation10 + $0x8] sm:$0xff] %vm747_vm6, %v809_v28  ;;  %1006 = vmatmul.msk.f32.vlgmr.msra.gmra.mxu0 %vm818_vm7, %v809_v28 }
 0x377   : > { %1025 = dma.vmem_to_hbm [thread:$0]  (%p1756_p1), %s878_s29, 256, %s880_s17, [#allocation11], %s1304_s15, %s1304_s15, %s1305_s21  }
 0x378   : > { %s854_s29 = scalar_lea.sflag [#allocation5], %s1493_s19  ;;  %s1236_s17 = sshra.s32 %s869_s3, 4  ;;  %s1237_s17 = int_to_ptr.hbm [resolvable:$true] %s1236_s17 }
 0x379   : > { %s1238_s15 = scalar_lea.hbm %s1237_s17, 8  ;;  %p1243_p7 = scmp.lt.s32.totalorder %s1237_s17, %s1759_s0 }
 0x37a   : > { %p1239_p4 = scmp.ne.s32.totalorder %s1237_s17, %s1238_s15  ;;  %p1244_p8 = scmp.lt.s32.totalorder %s1242_s27, %s1238_s15 }
 0x37c   : > { %p1240_p12 = pnand %p1239_p4, %p1462_p5  ;;  %p1245_p9 = por %p1244_p8, %p1243_p7 }
 0x37e   : > { %p1241_p13 = pneg %p1240_p12 }
 0x380   : > { %p1246_p10 = pnand %p1245_p9, %p1241_p13 }
 0x3f3   : > { %v839_v30 = vpop.f32.mrf.mxu0 }
 0x3f4   : > { %v840_v31 = vadd.f32 %v1097_v29, %v839_v30 }
 0x3f6   : > { %1102 = vtanh.f32 %v840_v31 }
 0x3fc   : > { %v1103_v32 = vpop.eup %1102 }
 0x3fd   : > { %845 = vst.msk [vmem:[#allocation2] sm:$0xff] %vm595_vm3, %v1103_v32 }
 0x3fe   : > { %846 = vst.msk [vmem:[%s1505_s14] sm:$0xff] %vm595_vm3, %v1103_v32 }
 0x3ff   : > { %852 = vst.msk [vmem:[%s1505_s14] sm:$0xff] %vm851_vm8, %v849_v33 }
 0x400   : > { %1249 = shalt.err (!%p1246_p10)
}
 0x401   : > { %1023 = dma.vmem_to_hbm [thread:$0]  (%p1462_p5), %s867_s1, 128, %s869_s3, %s854_s29  }
 0x402   : > { %p1761_p0 = pmov %p1756_p1 }
 0x404   : > { %1275 = dma.done.wait (%p1761_p0), [#allocation11], 256   ;;  %p1762_p11 = pmov %p1761_p0 }
 0x406   : > { %1277 = vsyncadd (%p1762_p11), [#allocation11], 4294967040 }
 0x407 PF: > { %s1763_s19 = sld [smem:[#allocation16_spill]]  ;;  %p1051_p2 = scmp.ge.s32.totalorder %s1296_s24, 2 }
 0x409   : > { %p1041_p3 = pnand %p1051_p2, %p1466_p6 }
 0x40b   : > { %p1042_p1 = pneg %p1041_p3 }
 0x40d   : > { %s899_s20 = sand.u32 1, %s1763_s19  }
 0x40e   : > { %s900_s16 = scalar_lea.sflag [#allocation5], %s899_s20 }
 0x40f   : > { %1279 = dma.done.wait (%p1042_p1), %s900_s16, 128  }
 0x410   : > { %1281 = vsyncadd (%p1042_p1), %s900_s16, 4294967168  ;;  %s1765_s24 = sld [smem:[#allocation18_spill]]  ;;  %s1768_s21 = smov %s1288_s22 }
 0x411   : > { %s1766_s1 = sld [smem:[#allocation17_spill]] }
 0x412   : > { %s1767_s23 = sld [smem:[#allocation19_spill]] }
 0x416   : > { %p32_p5 = scmp.ge.s32.totalorder %s1765_s24, 10  }
 0x417   : > { %s1769_s22 = smov %s1766_s1 }
 0x418   :  { %34 = sbr.rel (!%p32_p5) target bundleno = 16 (0x10), region = 146 }
 0x41d   :  { %906 = vsyncpa [#allocation4], 1 }
 0x41e   :  { %908 = vsyncpa [#allocation4 + $0x1], 1 }
 0x41f   :  { %909 = vsyncpa [#allocation7], 1 }
 0x420   :  { %910 = vsyncpa [#allocation5], 1 }
 0x421   :  { %912 = vsyncpa [#allocation5 + $0x1], 1 }
 0x422   :  { %913 = vsyncpa [#allocation11], 1 }

</bundles_post_ra>
